<compile_context>
chip_gen: v5e
topology: v5e:2x2
jax: 0.10.0
libtpu: 0.0.40
codegen_flags: <defaults>
</compile_context>

<pallas_src>
import functools

import jax
import jax.numpy as jnp
from jax.experimental import pallas as pl
from jax.experimental.pallas import tpu as pltpu

HIDDEN = 256


def _round_up(x, m):
    return (x + m - 1) // m * m


def _cdiv(a, b):
    return -(-a // b)


def actor_kernel(x_ref, w1_ref, b1_ref, w2_ref, b2_ref, w3_ref, b3_ref, mean_ref):
    # x: (TB, S) f32 -> cast to bf16 in-kernel (VPU) so the MXU runs its native bf16 path.
    # Weights bf16, biases f32, f32 accumulation + f32 ReLU/tanh epilogue throughout.
    x = x_ref[...].astype(jnp.bfloat16)

    h1 = jnp.dot(x, w1_ref[...], preferred_element_type=jnp.float32)            # (TB, H)
    h1 = jnp.maximum(h1 + b1_ref[...], 0.0)

    h2 = jnp.dot(h1.astype(jnp.bfloat16), w2_ref[...],
                 preferred_element_type=jnp.float32)                            # (TB, H)
    h2 = jnp.maximum(h2 + b2_ref[...], 0.0)

    out = jnp.dot(h2.astype(jnp.bfloat16), w3_ref[...],
                  preferred_element_type=jnp.float32)                           # (TB, A)
    mean_ref[...] = jnp.tanh(out + b3_ref[...])                                 # (TB, A) store


@functools.partial(jax.jit, static_argnames=("block_b",))
def actor_forward(state, params, block_b=2048):
    """Returns (mean, std) -- the parameters of the Normal distribution.

    mean: (B, A) float32.  std: (1, A) float32 = exp(log_std); it broadcasts against
    `mean` exactly like `log_std.exp().expand_as(mean)` in the PyTorch module.
    """
    w1, b1, w2, b2, w3, b3, log_std = params
    B, S = state.shape
    H = w1.shape[1]
    A = w3.shape[1]

    # --- batch tiling (all static Python ints) -------------------------------------
    # >= 2 tiles whenever B > 512 so the "parallel" axis uses both TensorCores on v7x.
    n_tiles = max(_cdiv(B, block_b), 2 if B > 512 else 1)
    TB = _round_up(_cdiv(B, n_tiles), 8)        # sublane-aligned tile height
    if TB >= B:
        TB = B                                  # one full-array block (always legal)
    grid = _cdiv(B, TB)                         # ragged last tile handled by Pallas masking

    R = grid * TB                               # rows actually pushed through the MXU
    flops = 2 * R * (S * H + H * H + H * A)
    transcendentals = R * A
    bytes_accessed = (B * S * 4                                  # f32 state read
                      + (w1.size + w2.size + w3.size) * 2        # bf16 weights (DMA'd once)
                      + (b1.size + b2.size + b3.size) * 4        # f32 biases
                      + B * A * 4)                               # f32 mean write

    mean = pl.pallas_call(
        actor_kernel,
        out_shape=jax.ShapeDtypeStruct((B, A), jnp.float32),
        grid=(grid,),
        in_specs=[
            pl.BlockSpec((TB, S), lambda i: (i, 0)),   # state: pipelined over batch tiles
            pl.BlockSpec((S, H), lambda i: (0, 0)),    # weights/biases: constant index map
            pl.BlockSpec((1, H), lambda i: (0, 0)),    #   -> VMEM-resident, DMA'd once
            pl.BlockSpec((H, H), lambda i: (0, 0)),
            pl.BlockSpec((1, H), lambda i: (0, 0)),
            pl.BlockSpec((H, A), lambda i: (0, 0)),
            pl.BlockSpec((1, A), lambda i: (0, 0)),
        ],
        out_specs=pl.BlockSpec((TB, A), lambda i: (i, 0)),
        compiler_params=pltpu.CompilerParams(
            dimension_semantics=("parallel",)),        # megacore-shard batch tiles (v7x)
        cost_estimate=pl.CostEstimate(
            flops=flops,
            transcendentals=transcendentals,
            bytes_accessed=bytes_accessed),
    )(state, w1, b1, w2, b2, w3, b3)

    std = jnp.exp(log_std)                             # (1, A); broadcasts like expand_as
    return mean, std


def init_actor_params(key, state_dim, action_dim, hidden=HIDDEN):
    """PyTorch-style uniform(+-1/sqrt(fan_in)) init.

    Weights are stored in bfloat16 (MXU-native input format; halves the weight HBM->VMEM
    traffic that dominates at small batch).  Biases and log_std stay float32.
    """
    ks = jax.random.split(key, 6)

    def linear(kw, kb, fan_in, fan_out):
        bound = 1.0 / jnp.sqrt(fan_in)
        w = jax.random.uniform(kw, (fan_in, fan_out), jnp.float32, -bound, bound)
        b = jax.random.uniform(kb, (1, fan_out), jnp.float32, -bound, bound)
        return w.astype(jnp.bfloat16), b

    w1, b1 = linear(ks[0], ks[1], state_dim, hidden)
    w2, b2 = linear(ks[2], ks[3], hidden, hidden)
    w3, b3 = linear(ks[4], ks[5], hidden, action_dim)
    log_std = jnp.zeros((1, action_dim), jnp.float32)  # nn.Parameter(torch.zeros(1, action_dim))
    return (w1, b1, w2, b2, w3, b3, log_std)


if __name__ == "__main__":
    key = jax.random.PRNGKey(0)
    k_state, k_params = jax.random.split(key)

    batch, state_dim, action_dim = 8, 32, 8
    state = jax.random.normal(k_state, (batch, state_dim), jnp.float32)
    params = init_actor_params(k_params, state_dim, action_dim)

    mean, std = actor_forward(state, params)
    jax.block_until_ready((mean, std))
    assert mean.shape == (batch, action_dim)
    assert std.shape == (1, action_dim)

    w1, b1, w2, b2, w3, b3, log_std = params

    # Reference 1: plain-JAX with the exact same bf16/f32 mixed-precision recipe as the kernel.
    xb = state.astype(jnp.bfloat16)
    h = jnp.maximum(jnp.dot(xb, w1, preferred_element_type=jnp.float32) + b1, 0.0)
    h = jnp.maximum(jnp.dot(h.astype(jnp.bfloat16), w2, preferred_element_type=jnp.float32) + b2, 0.0)
    ref_mean_mixed = jnp.tanh(
        jnp.dot(h.astype(jnp.bfloat16), w3, preferred_element_type=jnp.float32) + b3)

    # Reference 2: full-f32 math with the same (bf16-stored) weights -- loose tolerance
    # covers the bf16 activation rounding inside the kernel.
    h32 = jnp.maximum(state @ w1.astype(jnp.float32) + b1, 0.0)
    h32 = jnp.maximum(h32 @ w2.astype(jnp.float32) + b2, 0.0)
    ref_mean_f32 = jnp.tanh(h32 @ w3.astype(jnp.float32) + b3)

    assert jnp.allclose(mean, ref_mean_mixed, atol=1e-3, rtol=1e-3), \
        float(jnp.max(jnp.abs(mean - ref_mean_mixed)))
    assert jnp.allclose(mean, ref_mean_f32, atol=5e-2, rtol=5e-2), \
        float(jnp.max(jnp.abs(mean - ref_mean_f32)))
    assert jnp.allclose(std, jnp.exp(log_std), atol=1e-6, rtol=1e-6)
    # std broadcasts against mean exactly like log_std.exp().expand_as(mean):
    assert jnp.broadcast_to(std, mean.shape).shape == mean.shape

    print("KERNEL_OK")
</pallas_src>

<mosaic_0001>
module attributes {stable_mosaic.version = 11 : i64} {
  func.func @actor_kernel(%arg0: i32, %arg1: memref<8x32xf32, #tpu.memory_space<vmem>>, %arg2: memref<32x256xbf16, #tpu.memory_space<vmem>>, %arg3: memref<1x256xf32, #tpu.memory_space<vmem>>, %arg4: memref<256x256xbf16, #tpu.memory_space<vmem>>, %arg5: memref<1x256xf32, #tpu.memory_space<vmem>>, %arg6: memref<256x8xbf16, #tpu.memory_space<vmem>>, %arg7: memref<1x8xf32, #tpu.memory_space<vmem>>, %arg8: memref<8x8xf32, #tpu.memory_space<vmem>>) attributes {dimension_semantics = [#tpu.dimension_semantics<parallel>], iteration_bounds = array<i64: 1>, scalar_prefetch = 0 : i64, scratch_operands = 0 : i64, tpu.core_type = #tpu.core_type<tc>, window_params = [{transform_indices = @transform_0, window_bounds = array<i64: 8, 32>}, {pipeline_mode = #tpu.pipeline_mode<synchronous>, transform_indices = @transform_1, window_bounds = array<i64: 32, 256>}, {pipeline_mode = #tpu.pipeline_mode<synchronous>, transform_indices = @transform_2, window_bounds = array<i64: 1, 256>}, {pipeline_mode = #tpu.pipeline_mode<synchronous>, transform_indices = @transform_3, window_bounds = array<i64: 256, 256>}, {pipeline_mode = #tpu.pipeline_mode<synchronous>, transform_indices = @transform_4, window_bounds = array<i64: 1, 256>}, {pipeline_mode = #tpu.pipeline_mode<synchronous>, transform_indices = @transform_5, window_bounds = array<i64: 256, 8>}, {pipeline_mode = #tpu.pipeline_mode<synchronous>, transform_indices = @transform_6, window_bounds = array<i64: 1, 8>}, {transform_indices = @transform_7, window_bounds = array<i64: 8, 8>}]} {
    %c0 = arith.constant 0 : index
    %c0_0 = arith.constant 0 : index
    %0 = vector.load %arg1[%c0, %c0_0] : memref<8x32xf32, #tpu.memory_space<vmem>>, vector<8x32xf32>
    %1 = arith.truncf %0 : vector<8x32xf32> to vector<8x32xbf16>
    %c0_1 = arith.constant 0 : index
    %c0_2 = arith.constant 0 : index
    %2 = vector.load %arg2[%c0_1, %c0_2] : memref<32x256xbf16, #tpu.memory_space<vmem>>, vector<32x256xbf16>
    %cst = arith.constant dense<0.000000e+00> : vector<8x256xf32>
    %3 = tpu.matmul %1, %2, %cst {dimension_numbers = #tpu.dot_dimension_numbers<[1], [0], [0], [1], [0, 0, 1, 1], [], []>} : vector<8x32xbf16>, vector<32x256xbf16>, vector<8x256xf32> -> vector<8x256xf32>
    %c0_3 = arith.constant 0 : index
    %c0_4 = arith.constant 0 : index
    %4 = vector.load %arg3[%c0_3, %c0_4] : memref<1x256xf32, #tpu.memory_space<vmem>>, vector<1x256xf32>
    %5 = vector.broadcast %4 : vector<1x256xf32> to vector<8x256xf32>
    %6 = arith.addf %3, %5 : vector<8x256xf32>
    %cst_5 = arith.constant 0.000000e+00 : f32
    %7 = vector.broadcast %cst_5 : f32 to vector<8x256xf32>
    %8 = arith.maximumf %6, %7 : vector<8x256xf32>
    %9 = arith.truncf %8 : vector<8x256xf32> to vector<8x256xbf16>
    %c0_6 = arith.constant 0 : index
    %c0_7 = arith.constant 0 : index
    %10 = vector.load %arg4[%c0_6, %c0_7] : memref<256x256xbf16, #tpu.memory_space<vmem>>, vector<256x256xbf16>
    %cst_8 = arith.constant dense<0.000000e+00> : vector<8x256xf32>
    %11 = tpu.matmul %9, %10, %cst_8 {dimension_numbers = #tpu.dot_dimension_numbers<[1], [0], [0], [1], [0, 0, 1, 1], [], []>} : vector<8x256xbf16>, vector<256x256xbf16>, vector<8x256xf32> -> vector<8x256xf32>
    %c0_9 = arith.constant 0 : index
    %c0_10 = arith.constant 0 : index
    %12 = vector.load %arg5[%c0_9, %c0_10] : memref<1x256xf32, #tpu.memory_space<vmem>>, vector<1x256xf32>
    %13 = vector.broadcast %12 : vector<1x256xf32> to vector<8x256xf32>
    %14 = arith.addf %11, %13 : vector<8x256xf32>
    %cst_11 = arith.constant 0.000000e+00 : f32
    %15 = vector.broadcast %cst_11 : f32 to vector<8x256xf32>
    %16 = arith.maximumf %14, %15 : vector<8x256xf32>
    %17 = arith.truncf %16 : vector<8x256xf32> to vector<8x256xbf16>
    %c0_12 = arith.constant 0 : index
    %c0_13 = arith.constant 0 : index
    %18 = vector.load %arg6[%c0_12, %c0_13] : memref<256x8xbf16, #tpu.memory_space<vmem>>, vector<256x8xbf16>
    %cst_14 = arith.constant dense<0.000000e+00> : vector<8x8xf32>
    %19 = tpu.matmul %17, %18, %cst_14 {dimension_numbers = #tpu.dot_dimension_numbers<[1], [0], [0], [1], [0, 0, 1, 1], [], []>} : vector<8x256xbf16>, vector<256x8xbf16>, vector<8x8xf32> -> vector<8x8xf32>
    %c0_15 = arith.constant 0 : index
    %c0_16 = arith.constant 0 : index
    %20 = vector.load %arg7[%c0_15, %c0_16] : memref<1x8xf32, #tpu.memory_space<vmem>>, vector<1x8xf32>
    %21 = vector.broadcast %20 : vector<1x8xf32> to vector<8x8xf32>
    %22 = arith.addf %19, %21 : vector<8x8xf32>
    %23 = math.tanh %22 : vector<8x8xf32>
    %c0_17 = arith.constant 0 : index
    %c0_18 = arith.constant 0 : index
    %24 = vector.load %arg8[%c0_17, %c0_18] : memref<8x8xf32, #tpu.memory_space<vmem>>, vector<8x8xf32>
    tpu.vector_store %arg8[%c0_17, %c0_18], %23 {strides = array<i32>} : memref<8x8xf32, #tpu.memory_space<vmem>>, vector<8x8xf32>,
    return
  }
  func.func @transform_0(%arg0: i32) -> (i32, i32) {
    %c0_i32 = arith.constant 0 : i32
    %c0_i32_0 = arith.constant 0 : i32
    return %arg0, %c0_i32 : i32, i32
  }
  func.func @transform_1(%arg0: i32) -> (i32, i32) {
    %c0_i32 = arith.constant 0 : i32
    %c0_i32_0 = arith.constant 0 : i32
    %c0_i32_1 = arith.constant 0 : i32
    return %c0_i32, %c0_i32_0 : i32, i32
  }
  func.func @transform_2(%arg0: i32) -> (i32, i32) {
    %c0_i32 = arith.constant 0 : i32
    %c0_i32_0 = arith.constant 0 : i32
    %c0_i32_1 = arith.constant 0 : i32
    return %c0_i32, %c0_i32_0 : i32, i32
  }
  func.func @transform_3(%arg0: i32) -> (i32, i32) {
    %c0_i32 = arith.constant 0 : i32
    %c0_i32_0 = arith.constant 0 : i32
    %c0_i32_1 = arith.constant 0 : i32
    return %c0_i32, %c0_i32_0 : i32, i32
  }
  func.func @transform_4(%arg0: i32) -> (i32, i32) {
    %c0_i32 = arith.constant 0 : i32
    %c0_i32_0 = arith.constant 0 : i32
    %c0_i32_1 = arith.constant 0 : i32
    return %c0_i32, %c0_i32_0 : i32, i32
  }
  func.func @transform_5(%arg0: i32) -> (i32, i32) {
    %c0_i32 = arith.constant 0 : i32
    %c0_i32_0 = arith.constant 0 : i32
    %c0_i32_1 = arith.constant 0 : i32
    return %c0_i32, %c0_i32_0 : i32, i32
  }
  func.func @transform_6(%arg0: i32) -> (i32, i32) {
    %c0_i32 = arith.constant 0 : i32
    %c0_i32_0 = arith.constant 0 : i32
    %c0_i32_1 = arith.constant 0 : i32
    return %c0_i32, %c0_i32_0 : i32, i32
  }
  func.func @transform_7(%arg0: i32) -> (i32, i32) {
    %c0_i32 = arith.constant 0 : i32
    %c0_i32_0 = arith.constant 0 : i32
    return %arg0, %c0_i32 : i32, i32
  }
}

</mosaic_0001>

<bundles_post_ra>
// kernel: actor_forward.1
= control target key start
LH: loop header
LB: loop body
LE: loop exit
PB: predicated region body
PF: predicated region fallthrough
CT: control target
= control target key end

     0   :  { %12 = vsyncpa [#allocation3], 0  ;;  %s999_s0 = inlined_call_operand.vmem [shape: f32[8,32], index: 0, kind: input, shape index: {}]   ;;  %s1000_s1 = inlined_call_operand.vmem [shape: bf16[32,256], index: 1, kind: input, shape index: {}]   ;;  %s1001_s2 = inlined_call_operand.vmem [shape: f32[1,256], index: 2, kind: input, shape index: {}]   ;;  %s1002_s3 = inlined_call_operand.hbm [shape: bf16[256,256], index: 3, kind: input, shape index: {}]   ;;  %s1003_s4 = inlined_call_operand.vmem [shape: f32[1,256], index: 4, kind: input, shape index: {}]   ;;  %s1004_s5 = inlined_call_operand.vmem [shape: bf16[256,8], index: 5, kind: input, shape index: {}]   ;;  %s1005_s6 = inlined_call_operand.vmem [shape: f32[1,8], index: 6, kind: input, shape index: {}]   ;;  %s1006_s7 = inlined_call_operand.hbm [shape: f32[8,8], index: 7, kind: output, shape index: {}]  }
   0x1   :  { %13 = vsyncpa [#allocation4], 0  ;;  %s24_s26 = sshll.u32 %s1002_s3, 4  ;;  %s863_s27 = smov [#allocation2]   ;;  %s25_s26 = int_to_ptr.hbm [resolvable:$true] %s24_s26 }
   0x2   :  { %s26_s28 = sshll.u32 %s863_s27, 4  ;;  %s864_s29 = smov 128   ;;  %s27_s28 = int_to_ptr.vmem [resolvable:$true] %s26_s28 }
   0x3   :  { %s865_s30 = smov 8  }
   0x4   :  { %32 = dma.hbm_to_vmem [thread:$0]  %s25_s26, 4096, %s27_s28, [#allocation3], %s864_s29, %s864_s29, %s865_s30  }
   0x5   :  { %859 = dma.done.wait [#allocation3], 4096  }
   0x6   :  { %860 = vsyncadd [#allocation3], 4294963200  ;;  %v552_v0 = vld [vmem:[%s1000_s1 + $0x10] sm:$0xf]  ;;  %v755_v1 = vld [vmem:[%s1000_s1 + $0x14] sm:$0xf0] }
   0x7   :  { %v754_v2 = vld [vmem:[%s1000_s1 + $0x14] sm:$0xf]  ;;  %v553_v3 = vor.u32 %v755_v1, %v552_v0  ;;  %v554_v4 = vld [vmem:[%s1000_s1 + $0x18] sm:$0xf0]  ;;  %v544_v5 = vld [vmem:[%s1000_s1] sm:$0xf] }
   0x8   :  { %v753_v6 = vld [vmem:[%s1000_s1 + $0x4] sm:$0xf0]  ;;  %v557_v7 = vor.u32 %v754_v2, %v554_v4  ;;  %v752_v8 = vld [vmem:[%s1000_s1 + $0x4] sm:$0xf]  ;;  %v546_v9 = vld [vmem:[%s1000_s1 + $0x8] sm:$0xf0] }
   0x9   :  { %v44_v10 = vld [vmem:[%s999_s0] sm:$0xff]  ;;  %vm76_vm0 = vcmask 261120   ;;  %86 = vmatpush.bf16.msra.mxu0 %v553_v3  ;;  %v545_v11 = vor.u32 %v753_v6, %v544_v5  ;;  %v618_v12 = vld [vmem:[#allocation2 + $0x70] sm:$0xf]  ;;  %v771_v13 = vld [vmem:[#allocation2 + $0x74] sm:$0xf0]  ;;  %v549_v15 = vor.u32 %v752_v8, %v546_v9 }
   0xa   :  { %v682_v14 = vld [vmem:[#allocation2 + $0xf0] sm:$0xf]  ;;  %99 = vmatpush.bf16.msra.mxu1 %v557_v7  ;;  %v619_v16 = vor.u32 %v771_v13, %v618_v12  ;;  %v787_v17 = vld [vmem:[#allocation2 + $0xf4] sm:$0xf0]  ;;  %v770_v18 = vld [vmem:[#allocation2 + $0x74] sm:$0xf]  ;;  %v45_v25 = vpack.c.bf16 %v44_v10, %v44_v10 }
   0xb   :  { %v620_v19 = vld [vmem:[#allocation2 + $0x78] sm:$0xf0]  ;;  %v683_v20 = vor.u32 %v787_v17, %v682_v14  ;;  %v786_v22 = vld [vmem:[#allocation2 + $0xf4] sm:$0xf]  ;;  %v610_v24 = vld [vmem:[#allocation2 + $0x60] sm:$0xf] }
   0xc   :  { %v623_v21 = vor.u32 %v770_v18, %v620_v19  ;;  %v684_v23 = vld [vmem:[#allocation2 + $0xf8] sm:$0xf0]  ;;  %308 = vmatpush.bf16.msra.mxu2 %v619_v16  ;;  %v769_v27 = vld [vmem:[#allocation2 + $0x64] sm:$0xf0]  ;;  %v674_v28 = vld [vmem:[#allocation2 + $0xe0] sm:$0xf] }
   0xd   :  { %v687_v26 = vor.u32 %v786_v22, %v684_v23  ;;  %v785_v29 = vld [vmem:[#allocation2 + $0xe4] sm:$0xf0]  ;;  %87 = vmatpush.bf16.msra.mxu0 %v545_v11  ;;  %321 = vmatpush.bf16.msra.mxu3 %v683_v20  ;;  %v611_v30 = vor.u32 %v769_v27, %v610_v24  ;;  %v768_v32 = vld [vmem:[#allocation2 + $0x64] sm:$0xf]  ;;  %v612_v33 = vld [vmem:[#allocation2 + $0x68] sm:$0xf0] }
   0xe   :  { %v675_v31 = vor.u32 %v785_v29, %v674_v28  ;;  %v784_v34 = vld [vmem:[#allocation2 + $0xe4] sm:$0xf]  ;;  %100 = vmatpush.bf16.msra.mxu1 %v549_v15  ;;  %v615_v35 = vor.u32 %v768_v32, %v612_v33  ;;  %v676_v36 = vld [vmem:[#allocation2 + $0xe8] sm:$0xf0]  ;;  %v602_v37 = vld [vmem:[#allocation2 + $0x50] sm:$0xf] }
   0xf   :  { %v767_v38 = vld [vmem:[#allocation2 + $0x54] sm:$0xf0]  ;;  %v679_v39 = vor.u32 %v784_v34, %v676_v36  ;;  %v666_v40 = vld [vmem:[#allocation2 + $0xd0] sm:$0xf]  ;;  %v766_v42 = vld [vmem:[#allocation2 + $0x54] sm:$0xf] }
  0x10   :  { %v783_v41 = vld [vmem:[#allocation2 + $0xd4] sm:$0xf0]  ;;  %558 = vmatmul.msk.bf16.vlgmr.msra.gmra.mxu0 %vm76_vm0, %v45_v25  ;;  %309 = vmatpush.bf16.msra.mxu2 %v611_v30  ;;  %v603_v43 = vor.u32 %v767_v38, %v602_v37  ;;  %v604_v44 = vld [vmem:[#allocation2 + $0x58] sm:$0xf0]  ;;  %v782_v45 = vld [vmem:[#allocation2 + $0xd4] sm:$0xf] }
  0x11   :  { %334 = vmatpush.bf16.msrb.mxu0 %v623_v21  ;;  %v668_v46 = vld [vmem:[#allocation2 + $0xd8] sm:$0xf0]  ;;  %559 = vmatmul.msk.bf16.vlgmr.msra.gmra.mxu1 %vm76_vm0, %v45_v25  ;;  %v667_v47 = vor.u32 %v783_v41, %v666_v40  ;;  %v594_v48 = vld [vmem:[#allocation2 + $0x40] sm:$0xf]  ;;  %v765_v49 = vld [vmem:[#allocation2 + $0x44] sm:$0xf0]  ;;  %v607_v50 = vor.u32 %v766_v42, %v604_v44 }
  0x12   :  { %347 = vmatpush.bf16.msrb.mxu1 %v687_v26  ;;  %322 = vmatpush.bf16.msra.mxu3 %v675_v31  ;;  %v658_v51 = vld [vmem:[#allocation2 + $0xc0] sm:$0xf]  ;;  %v781_v52 = vld [vmem:[#allocation2 + $0xc4] sm:$0xf0]  ;;  %v671_v53 = vor.u32 %v782_v45, %v668_v46  ;;  %v764_v54 = vld [vmem:[#allocation2 + $0x44] sm:$0xf]  ;;  %v595_v56 = vor.u32 %v765_v49, %v594_v48 }
  0x13   :  { %v596_v55 = vld [vmem:[#allocation2 + $0x48] sm:$0xf0]  ;;  %v780_v57 = vld [vmem:[#allocation2 + $0xc4] sm:$0xf]  ;;  %v659_v59 = vor.u32 %v781_v52, %v658_v51  ;;  %v586_v60 = vld [vmem:[#allocation2 + $0x30] sm:$0xf] }
  0x14   :  { %310 = vmatpush.bf16.msra.mxu2 %v603_v43  ;;  %v660_v58 = vld [vmem:[#allocation2 + $0xc8] sm:$0xf0]  ;;  %v763_v61 = vld [vmem:[#allocation2 + $0x34] sm:$0xf0]  ;;  %v599_v62 = vor.u32 %v764_v54, %v596_v55  ;;  %v650_v63 = vld [vmem:[#allocation2 + $0xb0] sm:$0xf] }
  0x15   :  { %335 = vmatpush.bf16.msrb.mxu0 %v615_v35  ;;  %v779_v0 = vld [vmem:[#allocation2 + $0xb4] sm:$0xf0]  ;;  %v663_v1 = vor.u32 %v780_v57, %v660_v58  ;;  %v762_v2 = vld [vmem:[#allocation2 + $0x34] sm:$0xf]  ;;  %v588_v3 = vld [vmem:[#allocation2 + $0x38] sm:$0xf0]  ;;  %v587_v4 = vor.u32 %v763_v61, %v586_v60 }
  0x16   :  { %348 = vmatpush.bf16.msrb.mxu1 %v679_v39  ;;  %323 = vmatpush.bf16.msra.mxu3 %v667_v47  ;;  %v778_v5 = vld [vmem:[#allocation2 + $0xb4] sm:$0xf]  ;;  %v652_v6 = vld [vmem:[#allocation2 + $0xb8] sm:$0xf0]  ;;  %v651_v7 = vor.u32 %v779_v0, %v650_v63  ;;  %v578_v8 = vld [vmem:[#allocation2 + $0x20] sm:$0xf]  ;;  %v591_v10 = vor.u32 %v762_v2, %v588_v3 }
  0x17   :  { %v761_v9 = vld [vmem:[#allocation2 + $0x24] sm:$0xf0]  ;;  %v642_v11 = vld [vmem:[#allocation2 + $0xa0] sm:$0xf]  ;;  %v655_v13 = vor.u32 %v778_v5, %v652_v6  ;;  %v760_v14 = vld [vmem:[#allocation2 + $0x24] sm:$0xf] }
  0x18   :  { %311 = vmatpush.bf16.msra.mxu2 %v595_v56  ;;  %v777_v12 = vld [vmem:[#allocation2 + $0xa4] sm:$0xf0]  ;;  %v580_v15 = vld [vmem:[#allocation2 + $0x28] sm:$0xf0]  ;;  %v579_v16 = vor.u32 %v761_v9, %v578_v8  ;;  %v776_v17 = vld [vmem:[#allocation2 + $0xa4] sm:$0xf] }
  0x19   :  { %336 = vmatpush.bf16.msrb.mxu0 %v607_v50  ;;  %v644_v18 = vld [vmem:[#allocation2 + $0xa8] sm:$0xf0]  ;;  %v643_v19 = vor.u32 %v777_v12, %v642_v11  ;;  %v583_v20 = vor.u32 %v760_v14, %v580_v15  ;;  %v570_v22 = vld [vmem:[#allocation2 + $0x10] sm:$0xf]  ;;  %v759_v23 = vld [vmem:[#allocation2 + $0x14] sm:$0xf0] }
  0x1a   :  { %349 = vmatpush.bf16.msrb.mxu1 %v671_v53  ;;  %324 = vmatpush.bf16.msra.mxu3 %v659_v59  ;;  %v647_v21 = vor.u32 %v776_v17, %v644_v18  ;;  %v634_v24 = vld [vmem:[#allocation2 + $0x90] sm:$0xf]  ;;  %v571_v25 = vor.u32 %v759_v23, %v570_v22  ;;  %v775_v26 = vld [vmem:[#allocation2 + $0x94] sm:$0xf0]  ;;  %v758_v27 = vld [vmem:[#allocation2 + $0x14] sm:$0xf] }
  0x1b   :  { %v572_v28 = vld [vmem:[#allocation2 + $0x18] sm:$0xf0]  ;;  %v635_v29 = vor.u32 %v775_v26, %v634_v24  ;;  %v774_v31 = vld [vmem:[#allocation2 + $0x94] sm:$0xf]  ;;  %v562_v34 = vld [vmem:[#allocation2] sm:$0xf] }
  0x1c   :  { %312 = vmatpush.bf16.msra.mxu2 %v587_v4  ;;  %v575_v30 = vor.u32 %v758_v27, %v572_v28  ;;  %v636_v32 = vld [vmem:[#allocation2 + $0x98] sm:$0xf0]  ;;  %v757_v35 = vld [vmem:[#allocation2 + $0x4] sm:$0xf0]  ;;  %v626_v36 = vld [vmem:[#allocation2 + $0x80] sm:$0xf] }
  0x1d   :  { %337 = vmatpush.bf16.msrb.mxu0 %v599_v62  ;;  %v639_v33 = vor.u32 %v774_v31, %v636_v32  ;;  %v563_v37 = vor.u32 %v757_v35, %v562_v34  ;;  %v773_v38 = vld [vmem:[#allocation2 + $0x84] sm:$0xf0]  ;;  %v756_v39 = vld [vmem:[#allocation2 + $0x4] sm:$0xf]  ;;  %v564_v40 = vld [vmem:[#allocation2 + $0x8] sm:$0xf0] }
  0x1e   :  { %350 = vmatpush.bf16.msrb.mxu1 %v663_v1  ;;  %325 = vmatpush.bf16.msra.mxu3 %v651_v7  ;;  %v627_v41 = vor.u32 %v773_v38, %v626_v36  ;;  %v567_v42 = vor.u32 %v756_v39, %v564_v40  ;;  %v772_v43 = vld [vmem:[#allocation2 + $0x84] sm:$0xf]  ;;  %v628_v44 = vld [vmem:[#allocation2 + $0x88] sm:$0xf0]  ;;  %v803_v46 = vld [vmem:[%s1004_s5 + $0x78] sm:$0xff]  ;;  %s866_s9 = smov [#allocation5]  }
  0x1f   :  { %v631_v45 = vor.u32 %v772_v43, %v628_v44  ;;  %v795_v47 = vld [vmem:[%s1004_s5 + $0x38] sm:$0xff]  ;;  %v802_v48 = vld [vmem:[%s1004_s5 + $0x70] sm:$0xff]  ;;  %v801_v50 = vld [vmem:[%s1004_s5 + $0x68] sm:$0xff]  ;;  %s530_s10 = sshll.u32 %s866_s9, 4  ;;  %s532_s13 = sshll.u32 %s1006_s7, 4  ;;  %vm523_vm1 = vcmask 64512   ;;  %s531_s10 = int_to_ptr.vmem [resolvable:$true] %s530_s10  ;;  %s533_s13 = int_to_ptr.hbm [resolvable:$true] %s532_s13 }
  0x20   :  { %313 = vmatpush.bf16.msra.mxu2 %v579_v16  ;;  %v794_v49 = vld [vmem:[%s1004_s5 + $0x30] sm:$0xff]  ;;  %v793_v51 = vld [vmem:[%s1004_s5 + $0x28] sm:$0xff]  ;;  %v800_v52 = vld [vmem:[%s1004_s5 + $0x60] sm:$0xff] }
  0x21   :  { %338 = vmatpush.bf16.msrb.mxu0 %v591_v10  ;;  %v792_v53 = vld [vmem:[%s1004_s5 + $0x20] sm:$0xff]  ;;  %v799_v54 = vld [vmem:[%s1004_s5 + $0x58] sm:$0xff]  ;;  %v798_v56 = vld [vmem:[%s1004_s5 + $0x50] sm:$0xff] }
  0x22   :  { %351 = vmatpush.bf16.msrb.mxu1 %v655_v13  ;;  %326 = vmatpush.bf16.msra.mxu3 %v643_v19  ;;  %v50_v55 = vld [vmem:[%s1001_s2] sm:$0x3]  ;;  %v791_v5 = vld [vmem:[%s1004_s5 + $0x18] sm:$0xff]  ;;  %v797_v6 = vld [vmem:[%s1004_s5 + $0x48] sm:$0xff] }
  0x23   :  { %v52_v57 = vperm.slane %v50_v55, 0  ;;  %v53_v58 = vperm.slane %v50_v55, 1  ;;  %v790_v7 = vld [vmem:[%s1004_s5 + $0x10] sm:$0xff]  ;;  %v796_v8 = vld [vmem:[%s1004_s5 + $0x40] sm:$0xff]  ;;  %v789_v9 = vld [vmem:[%s1004_s5 + $0x8] sm:$0xff] }
  0x24   :  { %314 = vmatpush.bf16.msra.mxu2 %v571_v25  ;;  %v788_v10 = vld [vmem:[%s1004_s5] sm:$0xff] }
  0x25   :  { %339 = vmatpush.bf16.msrb.mxu0 %v583_v20  ;;  %v142_v11 = vld [vmem:[%s1003_s4] sm:$0x3] }
  0x26   :  { %352 = vmatpush.bf16.msrb.mxu1 %v647_v21  ;;  %327 = vmatpush.bf16.msra.mxu3 %v635_v29  ;;  %v145_v12 = vperm.slane %v142_v11, 1  ;;  %v144_v17 = vperm.slane %v142_v11, 0  ;;  %v808_v31 = vld [vmem:[%s1005_s6] ss:$0 sm:$0xff] }
  0x28   :  { %315 = vmatpush.bf16.msra.mxu2 %v563_v37 }
  0x29   :  { %340 = vmatpush.bf16.msrb.mxu0 %v575_v30 }
  0x2a   :  { %353 = vmatpush.bf16.msrb.mxu1 %v639_v33  ;;  %328 = vmatpush.bf16.msra.mxu3 %v627_v41 }
  0x2c   :  { %496 = vmatpush.bf16.msrb.mxu2 %v795_v47 }
  0x2d   :  { %341 = vmatpush.bf16.msrb.mxu0 %v567_v42 }
  0x2e   :  { %354 = vmatpush.bf16.msrb.mxu1 %v631_v45  ;;  %509 = vmatpush.bf16.msrb.mxu3 %v803_v46 }
  0x30   :  { %497 = vmatpush.bf16.msrb.mxu2 %v794_v49 }
  0x32   :  { %510 = vmatpush.bf16.msrb.mxu3 %v802_v48 }
  0x34   :  { %498 = vmatpush.bf16.msrb.mxu2 %v793_v51 }
  0x36   :  { %511 = vmatpush.bf16.msrb.mxu3 %v801_v50 }
  0x38   :  { %499 = vmatpush.bf16.msrb.mxu2 %v792_v53 }
  0x3a   :  { %512 = vmatpush.bf16.msrb.mxu3 %v800_v52 }
  0x3c   :  { %500 = vmatpush.bf16.msrb.mxu2 %v791_v5 }
  0x3e   :  { %513 = vmatpush.bf16.msrb.mxu3 %v799_v54 }
  0x40   :  { %501 = vmatpush.bf16.msrb.mxu2 %v790_v7 }
  0x42   :  { %514 = vmatpush.bf16.msrb.mxu3 %v798_v56 }
  0x44   :  { %502 = vmatpush.bf16.msrb.mxu2 %v789_v9 }
  0x46   :  { %515 = vmatpush.bf16.msrb.mxu3 %v797_v6 }
  0x48   :  { %503 = vmatpush.bf16.msrb.mxu2 %v788_v10 }
  0x4a   :  { %516 = vmatpush.bf16.msrb.mxu3 %v796_v8 }
  0x8d   :  { %v89_v59 = vpop.f32.mrf.mxu0 }
  0x8e   :  { %v90_v60 = vadd.f32 %v89_v59, %v52_v57  ;;  %v102_v61 = vpop.f32.mrf.mxu1 }
  0x8f   :  { %v103_v62 = vadd.f32 %v102_v61, %v53_v58 }
  0x90   :  { %v106_v63 = vmax.f32 %v90_v60, 0.0 }
  0x91   :  { %v107_v0 = vmax.f32 %v103_v62, 0.0 }
  0x92   :  { %v108_v1 = vpack.c.bf16 %v106_v63, %v106_v63 }
  0x93   :  { %v109_v2 = vpack.c.bf16 %v107_v0, %v107_v0 }
  0x94   :  { %316 = vmatmul.bf16.vlgmr.msra.gmra.mxu2 %v108_v1  ;;  %342 = vmatmul.bf16.vlgmr.msrb.gmra.mxu0 %v108_v1 }
  0x95   :  { %329 = vmatmul.bf16.vlgmr.msra.gmra.mxu3 %v109_v2  ;;  %355 = vmatmul.bf16.vlgmr.msrb.gmra.mxu1 %v109_v2  ;;  %v91_v3 = vpop.f32.mrf.mxu0 }
  0x96   :  { %v104_v4 = vpop.f32.mrf.mxu1 }
 0x111   :  { %v343_v13 = vpop.f32.mrf.mxu0 }
 0x112   :  { %v344_v14 = vadd.f32 %v343_v13, %v145_v12  ;;  %v356_v15 = vpop.f32.mrf.mxu1 }
 0x114   :  { %v357_v16 = vadd.f32 %v356_v15, %v344_v14 }
 0x116   :  { %v361_v18 = vmax.f32 %v357_v16, 0.0 }
 0x117   :  { %v317_v19 = vpop.f32.mrf.mxu2 }
 0x118   :  { %v363_v20 = vpack.c.bf16 %v361_v18, %v361_v18  ;;  %v318_v21 = vadd.f32 %v317_v19, %v144_v17  ;;  %v330_v22 = vpop.f32.mrf.mxu3 }
 0x119   :  { %v345_v23 = vpop.f32.mrf.mxu0 }
 0x11a   :  { %v331_v24 = vadd.f32 %v330_v22, %v318_v21  ;;  %v358_v25 = vpop.f32.mrf.mxu1  ;;  %517 = vmatmul.bf16.vlgmr.msrb.gmra.mxu3 %v363_v20 }
 0x11c   :  { %v360_v26 = vmax.f32 %v331_v24, 0.0 }
 0x11e   :  { %v362_v27 = vpack.c.bf16 %v360_v26, %v360_v26 }
 0x11f   :  { %v319_v28 = vpop.f32.mrf.mxu2 }
 0x120   :  { %v332_v29 = vpop.f32.mrf.mxu3  ;;  %504 = vmatmul.bf16.vlgmr.msrb.gmra.mxu2 %v362_v27 }
 0x19d   :  { %v518_v30 = vpop.f32.mrf.mxu3 }
 0x1a3   :  { %v505_v32 = vpop.f32.mrf.mxu2 }
 0x1a4   :  { %v506_v33 = vadd.f32 %v808_v31, %v505_v32 }
 0x1a5   :  { %v520_v34 = vpop.f32.mrf.mxu3 }
 0x1a6   :  { %v519_v35 = vadd.f32 %v518_v30, %v506_v33 }
 0x1a8   :  { %809 = vtanh.f32 %v519_v35 }
 0x1ab   :  { %v507_v36 = vpop.f32.mrf.mxu2 }
 0x1ae   :  { %v810_v37 = vpop.eup %809 }
 0x1af   :  { %524 = vst.msk [vmem:[#allocation5] sm:$0xff] %vm523_vm1, %v810_v37 }
 0x1b0   :  { %535 = dma.vmem_to_hbm [thread:$0]  %s531_s10, 128, %s533_s13, [#allocation4]  }
 0x1b1   :  { %861 = dma.done.wait [#allocation4], 128  }
 0x1b2   :  { %862 = vsyncadd [#allocation4], 4294967168 }
 0x1b3   :  { %540 = vsyncpa [#allocation3], 1 }
 0x1b4   :  { %541 = vsyncpa [#allocation4], 1 }

</bundles_post_ra>
